<compile_context>
chip_gen: v5e
topology: v5e:2x2
jax: 0.10.0
libtpu: 0.0.40
codegen_flags: <defaults>
</compile_context>

<pallas_src>
import jax
import jax.numpy as jnp
from jax.experimental import pallas as pl
from jax.experimental.pallas import tpu as pltpu


# ----------------------------- Pallas kernel --------------------------------

def _graphsage_fused_kernel(self1_ref, pre_ref, adj1_ref, sel2_ref, adj2_ref,
                            w1s_ref, w1n_ref, w2s_ref, w2n_ref,
                            wc_ref, bc_ref, out_ref):
    f32 = jnp.float32
    bf16 = jnp.bfloat16

    # ---- sage_layer1: relu(cat([self, mean_neigh]) @ W1.T) ----------------
    neigh1 = jnp.dot(adj1_ref[...], pre_ref[...], preferred_element_type=f32)
    h1 = jnp.dot(self1_ref[...], w1s_ref[...], preferred_element_type=f32)
    h1 = h1 + jnp.dot(neigh1.astype(bf16), w1n_ref[...],
                      preferred_element_type=f32)
    h1 = jnp.maximum(h1, 0.0).astype(bf16)          # (N1, E) — VMEM resident

    # ---- sage_layer2 -------------------------------------------------------
    # self2 = h1[self_idx2] expressed as a one-hot selection matmul (exact for
    # 1.0 one-hot entries), keeping h1 in VMEM and supporting arbitrary idx.
    self2 = jnp.dot(sel2_ref[...], h1, preferred_element_type=f32).astype(bf16)
    neigh2 = jnp.dot(adj2_ref[...], h1, preferred_element_type=f32).astype(bf16)
    h2 = jnp.dot(self2, w2s_ref[...], preferred_element_type=f32)
    h2 = h2 + jnp.dot(neigh2, w2n_ref[...], preferred_element_type=f32)
    h2 = jnp.maximum(h2, 0.0).astype(bf16)          # (N2, E) — VMEM resident

    # ---- classifier (lane-dense padded output) -----------------------------
    logits = jnp.dot(h2, wc_ref[...], preferred_element_type=f32) + bc_ref[...]
    out_ref[...] = logits.astype(out_ref.dtype)


# ------------------------------- wrappers ------------------------------------

def _full_spec(shape):
    # Whole-array block; all tensors here are tiny and fit VMEM comfortably.
    return pl.BlockSpec(shape, lambda i: tuple(0 for _ in shape))


def prepare_params(params, num_classes, lane_pad=128):
    """One-time parameter re-layout (hoisted out of the forward pass)."""
    w1, w2, wc, bc = params["w1"], params["w2"], params["wc"], params["bc"]
    feat_dim = w1.shape[1] // 2
    embed_dim = w2.shape[1] // 2
    bf16 = jnp.bfloat16

    wc_pad = jnp.zeros((embed_dim, lane_pad), jnp.float32)
    wc_pad = wc_pad.at[:, :num_classes].set(wc.T.astype(jnp.float32))
    bc_pad = jnp.zeros((1, lane_pad), jnp.float32)
    bc_pad = bc_pad.at[0, :num_classes].set(bc.astype(jnp.float32))

    return {
        "w1_self": jnp.asarray(w1[:, :feat_dim].T, bf16),    # (F, E)
        "w1_neigh": jnp.asarray(w1[:, feat_dim:].T, bf16),   # (F, E)
        "w2_self": jnp.asarray(w2[:, :embed_dim].T, bf16),   # (E, E)
        "w2_neigh": jnp.asarray(w2[:, embed_dim:].T, bf16),  # (E, E)
        "wc_pad": wc_pad.astype(bf16),                       # (E, lane_pad)
        "bc_pad": bc_pad,                                    # (1, lane_pad) f32
        "num_classes": num_classes,
    }


def prepare_batch(raw_feats, self_idx1, adj1, self_idx2, adj2):
    """Per-batch sampler glue: casts, self gather (layer 1), one-hot select."""
    bf16 = jnp.bfloat16
    pre = raw_feats.astype(bf16)
    return {
        "pre": pre,                                         # (N0, F)
        "self1": pre[self_idx1],                            # (N1, F) gather
        "adj1": adj1.astype(bf16),                          # (N1, N0)
        "sel2": jax.nn.one_hot(self_idx2, adj2.shape[1], dtype=bf16),  # (N2,N1)
        "adj2": adj2.astype(bf16),                          # (N2, N1)
    }


def graphsage_forward(batch, p):
    """Full GraphSage.forward for a batch of target nodes (fused kernel)."""
    n1, n0 = batch["adj1"].shape
    n2 = batch["adj2"].shape[0]
    feat_dim = batch["pre"].shape[1]
    embed_dim = p["w2_self"].shape[1]
    lane_pad = p["wc_pad"].shape[1]

    inputs = (batch["self1"], batch["pre"], batch["adj1"], batch["sel2"],
              batch["adj2"], p["w1_self"], p["w1_neigh"], p["w2_self"],
              p["w2_neigh"], p["wc_pad"], p["bc_pad"])

    flops = 2 * (n1 * n0 * feat_dim                 # adj1 @ pre
                 + 2 * n1 * feat_dim * embed_dim    # layer-1 combine
                 + 2 * n2 * n1 * embed_dim          # sel2 @ h1, adj2 @ h1
                 + 2 * n2 * embed_dim * embed_dim   # layer-2 combine
                 + n2 * embed_dim * lane_pad)       # classifier
    bytes_accessed = (sum(int(x.size) * x.dtype.itemsize for x in inputs)
                      + n2 * lane_pad * 4)

    out_padded = pl.pallas_call(
        _graphsage_fused_kernel,
        out_shape=jax.ShapeDtypeStruct((n2, lane_pad), jnp.float32),
        grid=(1,),
        in_specs=[_full_spec(x.shape) for x in inputs],
        out_specs=_full_spec((n2, lane_pad)),
        compiler_params=pltpu.CompilerParams(
            dimension_semantics=("arbitrary",)),
        cost_estimate=pl.CostEstimate(flops=flops, transcendentals=0,
                                      bytes_accessed=bytes_accessed),
    )(*inputs)
    return out_padded[:, :p["num_classes"]]


# --------------------------------- main ---------------------------------------

if __name__ == "__main__":
    key = jax.random.PRNGKey(0)

    feat_dim = 128      # raw feature dim
    embed_dim = 128     # GraphSAGE embedding dim
    num_classes = 8
    num_sample = 5
    N0, N1, N2 = 256, 128, 64   # unique node counts per sampling layer
                                # (N2 = batch of target nodes)

    keys = jax.random.split(key, 10)

    # Raw (dense-ified) features for the layer-0 unique node set.
    raw_feats = jax.random.normal(keys[0], (N0, feat_dim), jnp.float32)

    # Synthetic deterministic sampler output: each layer-i node samples
    # `num_sample` neighbours from the layer-(i-1) node set, encoded as a
    # row-normalized 0/1 mask => matmul performs the mean aggregation.
    def make_adj(k, n_cur, n_prev):
        cols = jax.random.randint(k, (n_cur, num_sample), 0, n_prev)
        rows = jnp.repeat(jnp.arange(n_cur), num_sample)
        mask = jnp.zeros((n_cur, n_prev), jnp.float32)
        mask = mask.at[rows, cols.reshape(-1)].set(1.0)
        deg = jnp.maximum(mask.sum(axis=1, keepdims=True), 1.0)
        return mask / deg

    adj1 = make_adj(keys[1], N1, N0)
    adj2 = make_adj(keys[2], N2, N1)

    # Arbitrary (non-prefix) index sets to exercise the general gather path.
    self_idx1 = jax.random.permutation(keys[3], N0)[:N1]
    self_idx2 = jax.random.permutation(keys[4], N1)[:N2]

    # SageLayer weight is (out_dim, 2*in_dim); Classifer is Linear(E, C).
    params = {
        "w1": 0.05 * jax.random.normal(keys[5], (embed_dim, 2 * feat_dim),
                                       jnp.float32),
        "w2": 0.05 * jax.random.normal(keys[6], (embed_dim, 2 * embed_dim),
                                       jnp.float32),
        "wc": 0.05 * jax.random.normal(keys[7], (num_classes, embed_dim),
                                       jnp.float32),
        "bc": 0.05 * jax.random.normal(keys[8], (num_classes,), jnp.float32),
    }

    prepped = prepare_params(params, num_classes)          # one-time re-layout
    batch = prepare_batch(raw_feats, self_idx1, adj1, self_idx2, adj2)

    out = graphsage_forward(batch, prepped)
    out = jax.block_until_ready(out)
    assert out.shape == (N2, num_classes) and out.dtype == jnp.float32

    # Reference 1: same bf16-operand / f32-accumulate math in plain JAX
    # (mirrors the kernel exactly) — tight tolerance.
    def kernel_math_ref(b, p):
        f32, bf16 = jnp.float32, jnp.bfloat16
        neigh1 = jnp.dot(b["adj1"], b["pre"],
                         preferred_element_type=f32).astype(bf16)
        h1 = (jnp.dot(b["self1"], p["w1_self"], preferred_element_type=f32)
              + jnp.dot(neigh1, p["w1_neigh"], preferred_element_type=f32))
        h1 = jnp.maximum(h1, 0.0).astype(bf16)
        self2 = jnp.dot(b["sel2"], h1, preferred_element_type=f32).astype(bf16)
        neigh2 = jnp.dot(b["adj2"], h1, preferred_element_type=f32).astype(bf16)
        h2 = (jnp.dot(self2, p["w2_self"], preferred_element_type=f32)
              + jnp.dot(neigh2, p["w2_neigh"], preferred_element_type=f32))
        h2 = jnp.maximum(h2, 0.0).astype(bf16)
        logits = jnp.dot(h2, p["wc_pad"], preferred_element_type=f32) \
            + p["bc_pad"]
        return logits[:, :p["num_classes"]]

    assert jnp.allclose(out, kernel_math_ref(batch, prepped),
                        atol=1e-2, rtol=1e-2)

    # Reference 2: original-module f32 semantics — loose tolerance (bf16 cast).
    def spec_ref():
        pre = raw_feats
        neigh1 = adj1 @ pre
        comb1 = jnp.concatenate([pre[self_idx1], neigh1], axis=1)
        h1 = jnp.maximum(comb1 @ params["w1"].T, 0.0)
        neigh2 = adj2 @ h1
        comb2 = jnp.concatenate([h1[self_idx2], neigh2], axis=1)
        h2 = jnp.maximum(comb2 @ params["w2"].T, 0.0)
        return h2 @ params["wc"].T + params["bc"][None, :]

    assert jnp.allclose(out, spec_ref(), atol=1e-1, rtol=1e-1)

    print("KERNEL_OK")
</pallas_src>

<mosaic_0001>
module attributes {stable_mosaic.version = 11 : i64} {
  func.func @_graphsage_fused_kernel(%arg0: i32, %arg1: memref<128x128xbf16, #tpu.memory_space<vmem>>, %arg2: memref<256x128xbf16, #tpu.memory_space<vmem>>, %arg3: memref<128x256xbf16, #tpu.memory_space<vmem>>, %arg4: memref<64x128xbf16, #tpu.memory_space<vmem>>, %arg5: memref<64x128xbf16, #tpu.memory_space<vmem>>, %arg6: memref<128x128xbf16, #tpu.memory_space<vmem>>, %arg7: memref<128x128xbf16, #tpu.memory_space<vmem>>, %arg8: memref<128x128xbf16, #tpu.memory_space<vmem>>, %arg9: memref<128x128xbf16, #tpu.memory_space<vmem>>, %arg10: memref<128x128xbf16, #tpu.memory_space<vmem>>, %arg11: memref<1x128xf32, #tpu.memory_space<vmem>>, %arg12: memref<64x128xf32, #tpu.memory_space<vmem>>) attributes {dimension_semantics = [#tpu.dimension_semantics<arbitrary>], iteration_bounds = array<i64: 1>, scalar_prefetch = 0 : i64, scratch_operands = 0 : i64, tpu.core_type = #tpu.core_type<tc>, window_params = [{pipeline_mode = #tpu.pipeline_mode<synchronous>, transform_indices = @transform_0, window_bounds = array<i64: 128, 128>}, {pipeline_mode = #tpu.pipeline_mode<synchronous>, transform_indices = @transform_1, window_bounds = array<i64: 256, 128>}, {pipeline_mode = #tpu.pipeline_mode<synchronous>, transform_indices = @transform_2, window_bounds = array<i64: 128, 256>}, {pipeline_mode = #tpu.pipeline_mode<synchronous>, transform_indices = @transform_3, window_bounds = array<i64: 64, 128>}, {pipeline_mode = #tpu.pipeline_mode<synchronous>, transform_indices = @transform_4, window_bounds = array<i64: 64, 128>}, {pipeline_mode = #tpu.pipeline_mode<synchronous>, transform_indices = @transform_5, window_bounds = array<i64: 128, 128>}, {pipeline_mode = #tpu.pipeline_mode<synchronous>, transform_indices = @transform_6, window_bounds = array<i64: 128, 128>}, {pipeline_mode = #tpu.pipeline_mode<synchronous>, transform_indices = @transform_7, window_bounds = array<i64: 128, 128>}, {pipeline_mode = #tpu.pipeline_mode<synchronous>, transform_indices = @transform_8, window_bounds = array<i64: 128, 128>}, {pipeline_mode = #tpu.pipeline_mode<synchronous>, transform_indices = @transform_9, window_bounds = array<i64: 128, 128>}, {pipeline_mode = #tpu.pipeline_mode<synchronous>, transform_indices = @transform_10, window_bounds = array<i64: 1, 128>}, {pipeline_mode = #tpu.pipeline_mode<synchronous>, transform_indices = @transform_11, window_bounds = array<i64: 64, 128>}]} {
    %c0 = arith.constant 0 : index
    %c0_0 = arith.constant 0 : index
    %0 = vector.load %arg3[%c0, %c0_0] : memref<128x256xbf16, #tpu.memory_space<vmem>>, vector<128x256xbf16>
    %c0_1 = arith.constant 0 : index
    %c0_2 = arith.constant 0 : index
    %1 = vector.load %arg2[%c0_1, %c0_2] : memref<256x128xbf16, #tpu.memory_space<vmem>>, vector<256x128xbf16>
    %cst = arith.constant dense<0.000000e+00> : vector<128x128xf32>
    %2 = tpu.matmul %0, %1, %cst {dimension_numbers = #tpu.dot_dimension_numbers<[1], [0], [0], [1], [0, 0, 1, 1], [], []>} : vector<128x256xbf16>, vector<256x128xbf16>, vector<128x128xf32> -> vector<128x128xf32>
    %c0_3 = arith.constant 0 : index
    %c0_4 = arith.constant 0 : index
    %3 = vector.load %arg1[%c0_3, %c0_4] : memref<128x128xbf16, #tpu.memory_space<vmem>>, vector<128x128xbf16>
    %c0_5 = arith.constant 0 : index
    %c0_6 = arith.constant 0 : index
    %4 = vector.load %arg6[%c0_5, %c0_6] : memref<128x128xbf16, #tpu.memory_space<vmem>>, vector<128x128xbf16>
    %cst_7 = arith.constant dense<0.000000e+00> : vector<128x128xf32>
    %5 = tpu.matmul %3, %4, %cst_7 {dimension_numbers = #tpu.dot_dimension_numbers<[1], [0], [0], [1], [0, 0, 1, 1], [], []>} : vector<128x128xbf16>, vector<128x128xbf16>, vector<128x128xf32> -> vector<128x128xf32>
    %6 = arith.truncf %2 : vector<128x128xf32> to vector<128x128xbf16>
    %c0_8 = arith.constant 0 : index
    %c0_9 = arith.constant 0 : index
    %7 = vector.load %arg7[%c0_8, %c0_9] : memref<128x128xbf16, #tpu.memory_space<vmem>>, vector<128x128xbf16>
    %cst_10 = arith.constant dense<0.000000e+00> : vector<128x128xf32>
    %8 = tpu.matmul %6, %7, %cst_10 {dimension_numbers = #tpu.dot_dimension_numbers<[1], [0], [0], [1], [0, 0, 1, 1], [], []>} : vector<128x128xbf16>, vector<128x128xbf16>, vector<128x128xf32> -> vector<128x128xf32>
    %9 = arith.addf %5, %8 : vector<128x128xf32>
    %cst_11 = arith.constant 0.000000e+00 : f32
    %10 = vector.broadcast %cst_11 : f32 to vector<128x128xf32>
    %11 = arith.maximumf %9, %10 : vector<128x128xf32>
    %12 = arith.truncf %11 : vector<128x128xf32> to vector<128x128xbf16>
    %c0_12 = arith.constant 0 : index
    %c0_13 = arith.constant 0 : index
    %13 = vector.load %arg4[%c0_12, %c0_13] : memref<64x128xbf16, #tpu.memory_space<vmem>>, vector<64x128xbf16>
    %cst_14 = arith.constant dense<0.000000e+00> : vector<64x128xf32>
    %14 = tpu.matmul %13, %12, %cst_14 {dimension_numbers = #tpu.dot_dimension_numbers<[1], [0], [0], [1], [0, 0, 1, 1], [], []>} : vector<64x128xbf16>, vector<128x128xbf16>, vector<64x128xf32> -> vector<64x128xf32>
    %15 = arith.truncf %14 : vector<64x128xf32> to vector<64x128xbf16>
    %c0_15 = arith.constant 0 : index
    %c0_16 = arith.constant 0 : index
    %16 = vector.load %arg5[%c0_15, %c0_16] : memref<64x128xbf16, #tpu.memory_space<vmem>>, vector<64x128xbf16>
    %cst_17 = arith.constant dense<0.000000e+00> : vector<64x128xf32>
    %17 = tpu.matmul %16, %12, %cst_17 {dimension_numbers = #tpu.dot_dimension_numbers<[1], [0], [0], [1], [0, 0, 1, 1], [], []>} : vector<64x128xbf16>, vector<128x128xbf16>, vector<64x128xf32> -> vector<64x128xf32>
    %18 = arith.truncf %17 : vector<64x128xf32> to vector<64x128xbf16>
    %c0_18 = arith.constant 0 : index
    %c0_19 = arith.constant 0 : index
    %19 = vector.load %arg8[%c0_18, %c0_19] : memref<128x128xbf16, #tpu.memory_space<vmem>>, vector<128x128xbf16>
    %cst_20 = arith.constant dense<0.000000e+00> : vector<64x128xf32>
    %20 = tpu.matmul %15, %19, %cst_20 {dimension_numbers = #tpu.dot_dimension_numbers<[1], [0], [0], [1], [0, 0, 1, 1], [], []>} : vector<64x128xbf16>, vector<128x128xbf16>, vector<64x128xf32> -> vector<64x128xf32>
    %c0_21 = arith.constant 0 : index
    %c0_22 = arith.constant 0 : index
    %21 = vector.load %arg9[%c0_21, %c0_22] : memref<128x128xbf16, #tpu.memory_space<vmem>>, vector<128x128xbf16>
    %cst_23 = arith.constant dense<0.000000e+00> : vector<64x128xf32>
    %22 = tpu.matmul %18, %21, %cst_23 {dimension_numbers = #tpu.dot_dimension_numbers<[1], [0], [0], [1], [0, 0, 1, 1], [], []>} : vector<64x128xbf16>, vector<128x128xbf16>, vector<64x128xf32> -> vector<64x128xf32>
    %23 = arith.addf %20, %22 : vector<64x128xf32>
    %cst_24 = arith.constant 0.000000e+00 : f32
    %24 = vector.broadcast %cst_24 : f32 to vector<64x128xf32>
    %25 = arith.maximumf %23, %24 : vector<64x128xf32>
    %26 = arith.truncf %25 : vector<64x128xf32> to vector<64x128xbf16>
    %c0_25 = arith.constant 0 : index
    %c0_26 = arith.constant 0 : index
    %27 = vector.load %arg10[%c0_25, %c0_26] : memref<128x128xbf16, #tpu.memory_space<vmem>>, vector<128x128xbf16>
    %cst_27 = arith.constant dense<0.000000e+00> : vector<64x128xf32>
    %28 = tpu.matmul %26, %27, %cst_27 {dimension_numbers = #tpu.dot_dimension_numbers<[1], [0], [0], [1], [0, 0, 1, 1], [], []>} : vector<64x128xbf16>, vector<128x128xbf16>, vector<64x128xf32> -> vector<64x128xf32>
    %c0_28 = arith.constant 0 : index
    %c0_29 = arith.constant 0 : index
    %29 = vector.load %arg11[%c0_28, %c0_29] : memref<1x128xf32, #tpu.memory_space<vmem>>, vector<1x128xf32>
    %30 = vector.broadcast %29 : vector<1x128xf32> to vector<64x128xf32>
    %31 = arith.addf %28, %30 : vector<64x128xf32>
    %c0_30 = arith.constant 0 : index
    %c0_31 = arith.constant 0 : index
    %32 = vector.load %arg12[%c0_30, %c0_31] : memref<64x128xf32, #tpu.memory_space<vmem>>, vector<64x128xf32>
    tpu.vector_store %arg12[%c0_30, %c0_31], %31 {strides = array<i32>} : memref<64x128xf32, #tpu.memory_space<vmem>>, vector<64x128xf32>,
    return
  }
  func.func @transform_0(%arg0: i32) -> (i32, i32) {
    %c0_i32 = arith.constant 0 : i32
    %c0_i32_0 = arith.constant 0 : i32
    %c0_i32_1 = arith.constant 0 : i32
    return %c0_i32, %c0_i32_0 : i32, i32
  }
  func.func @transform_1(%arg0: i32) -> (i32, i32) {
    %c0_i32 = arith.constant 0 : i32
    %c0_i32_0 = arith.constant 0 : i32
    %c0_i32_1 = arith.constant 0 : i32
    return %c0_i32, %c0_i32_0 : i32, i32
  }
  func.func @transform_2(%arg0: i32) -> (i32, i32) {
    %c0_i32 = arith.constant 0 : i32
    %c0_i32_0 = arith.constant 0 : i32
    %c0_i32_1 = arith.constant 0 : i32
    return %c0_i32, %c0_i32_0 : i32, i32
  }
  func.func @transform_3(%arg0: i32) -> (i32, i32) {
    %c0_i32 = arith.constant 0 : i32
    %c0_i32_0 = arith.constant 0 : i32
    %c0_i32_1 = arith.constant 0 : i32
    return %c0_i32, %c0_i32_0 : i32, i32
  }
  func.func @transform_4(%arg0: i32) -> (i32, i32) {
    %c0_i32 = arith.constant 0 : i32
    %c0_i32_0 = arith.constant 0 : i32
    %c0_i32_1 = arith.constant 0 : i32
    return %c0_i32, %c0_i32_0 : i32, i32
  }
  func.func @transform_5(%arg0: i32) -> (i32, i32) {
    %c0_i32 = arith.constant 0 : i32
    %c0_i32_0 = arith.constant 0 : i32
    %c0_i32_1 = arith.constant 0 : i32
    return %c0_i32, %c0_i32_0 : i32, i32
  }
  func.func @transform_6(%arg0: i32) -> (i32, i32) {
    %c0_i32 = arith.constant 0 : i32
    %c0_i32_0 = arith.constant 0 : i32
    %c0_i32_1 = arith.constant 0 : i32
    return %c0_i32, %c0_i32_0 : i32, i32
  }
  func.func @transform_7(%arg0: i32) -> (i32, i32) {
    %c0_i32 = arith.constant 0 : i32
    %c0_i32_0 = arith.constant 0 : i32
    %c0_i32_1 = arith.constant 0 : i32
    return %c0_i32, %c0_i32_0 : i32, i32
  }
  func.func @transform_8(%arg0: i32) -> (i32, i32) {
    %c0_i32 = arith.constant 0 : i32
    %c0_i32_0 = arith.constant 0 : i32
    %c0_i32_1 = arith.constant 0 : i32
    return %c0_i32, %c0_i32_0 : i32, i32
  }
  func.func @transform_9(%arg0: i32) -> (i32, i32) {
    %c0_i32 = arith.constant 0 : i32
    %c0_i32_0 = arith.constant 0 : i32
    %c0_i32_1 = arith.constant 0 : i32
    return %c0_i32, %c0_i32_0 : i32, i32
  }
  func.func @transform_10(%arg0: i32) -> (i32, i32) {
    %c0_i32 = arith.constant 0 : i32
    %c0_i32_0 = arith.constant 0 : i32
    %c0_i32_1 = arith.constant 0 : i32
    return %c0_i32, %c0_i32_0 : i32, i32
  }
  func.func @transform_11(%arg0: i32) -> (i32, i32) {
    %c0_i32 = arith.constant 0 : i32
    %c0_i32_0 = arith.constant 0 : i32
    %c0_i32_1 = arith.constant 0 : i32
    return %c0_i32, %c0_i32_0 : i32, i32
  }
}

</mosaic_0001>

<bundles_post_ra>
// kernel: tpu_custom_call.1
= control target key start
LH: loop header
LB: loop body
LE: loop exit
PB: predicated region body
PF: predicated region fallthrough
CT: control target
= control target key end

     0   :  { %16 = vsyncpa [#allocation3], 0  ;;  %s2205_s0 = inlined_call_operand.hbm [shape: bf16[128,128], index: 0, kind: input, shape index: {}]   ;;  %s2206_s1 = inlined_call_operand.hbm [shape: bf16[256,128], index: 1, kind: input, shape index: {}]   ;;  %s2207_s2 = inlined_call_operand.hbm [shape: bf16[128,256], index: 2, kind: input, shape index: {}]   ;;  %s2208_s3 = inlined_call_operand.hbm [shape: bf16[64,128], index: 3, kind: input, shape index: {}]   ;;  %s2209_s4 = inlined_call_operand.hbm [shape: bf16[64,128], index: 4, kind: input, shape index: {}]   ;;  %s2210_s5 = inlined_call_operand.hbm [shape: bf16[128,128], index: 5, kind: input, shape index: {}]   ;;  %s2211_s6 = inlined_call_operand.hbm [shape: bf16[128,128], index: 6, kind: input, shape index: {}]   ;;  %s2212_s7 = inlined_call_operand.hbm [shape: bf16[128,128], index: 7, kind: input, shape index: {}]   ;;  %s2213_s8 = inlined_call_operand.hbm [shape: bf16[128,128], index: 8, kind: input, shape index: {}]   ;;  %s2214_s9 = inlined_call_operand.hbm [shape: bf16[128,128], index: 9, kind: input, shape index: {}]   ;;  %s2215_s10 = inlined_call_operand.vmem [shape: f32[1,128], index: 10, kind: input, shape index: {}]   ;;  %s2216_s11 = inlined_call_operand.hbm [shape: f32[64,128], index: 11, kind: output, shape index: {}]  }
   0x1   :  { %17 = vsyncpa [#allocation6], 0 }
   0x2   :  { %18 = vsyncpa [#allocation9], 0 }
   0x3   :  { %19 = vsyncpa [#allocation12], 0 }
   0x4   :  { %20 = vsyncpa [#allocation15], 0 }
   0x5   :  { %21 = vsyncpa [#allocation18], 0 }
   0x6   :  { %22 = vsyncpa [#allocation4], 0  ;;  %s40_s19 = sshll.u32 %s2206_s1, 4  ;;  %s2046_s20 = smov [#allocation5]   ;;  %s41_s19 = int_to_ptr.hbm [resolvable:$true] %s40_s19 }
   0x7   :  { %s42_s21 = sshll.u32 %s2046_s20, 4  ;;  %s66_s24 = sshll.u32 %s2208_s3, 4  ;;  %s43_s21 = int_to_ptr.vmem [resolvable:$true] %s42_s21  ;;  %s67_s24 = int_to_ptr.hbm [resolvable:$true] %s66_s24 }
   0x8   :  { %s2047_s25 = smov 64   ;;  %s2048_s26 = smov 4  }
   0x9   :  { %48 = dma.hbm_to_vmem [thread:$0]  %s41_s19, 2048, %s43_s21, [#allocation6], %s2047_s25, %s2047_s25, %s2048_s26  }
   0xa   :  { %s2049_s27 = smov [#allocation8]   ;;  %s92_s1 = sshll.u32 %s2210_s5, 4  ;;  %s93_s1 = int_to_ptr.hbm [resolvable:$true] %s92_s1 }
   0xb   :  { %s68_s28 = sshll.u32 %s2049_s27, 4  ;;  %s118_s13 = sshll.u32 %s2212_s7, 4  ;;  %s69_s28 = int_to_ptr.vmem [resolvable:$true] %s68_s28  ;;  %s119_s13 = int_to_ptr.hbm [resolvable:$true] %s118_s13 }
   0xc   :  { %74 = dma.hbm_to_vmem [thread:$0]  %s67_s24, 512, %s69_s28, [#allocation9], %s2047_s25, %s2047_s25, %s2048_s26  }
   0xd   :  { %s2050_s14 = smov [#allocation11]   ;;  %s2051_s16 = smov [#allocation14]  }
   0xe   :  { %s94_s15 = sshll.u32 %s2050_s14, 4  ;;  %s120_s5 = sshll.u32 %s2051_s16, 4  ;;  %s95_s15 = int_to_ptr.vmem [resolvable:$true] %s94_s15  ;;  %s121_s5 = int_to_ptr.vmem [resolvable:$true] %s120_s5 }
   0xf   :  { %100 = dma.hbm_to_vmem [thread:$0]  %s93_s1, 1024, %s95_s15, [#allocation12], %s2047_s25, %s2047_s25, %s2048_s26  }
  0x10   :  { %s27_s19 = sshll.u32 %s2205_s0, 4  ;;  %s53_s21 = sshll.u32 %s2207_s2, 4  ;;  %s28_s19 = int_to_ptr.hbm [resolvable:$true] %s27_s19  ;;  %s54_s21 = int_to_ptr.hbm [resolvable:$true] %s53_s21 }
  0x11   :  { %126 = dma.hbm_to_vmem [thread:$0]  %s119_s13, 1024, %s121_s5, [#allocation15], %s2047_s25, %s2047_s25, %s2048_s26  }
  0x12   :  { %s2052_s22 = smov [#allocation2]   ;;  %s2053_s24 = smov [#allocation7]  }
  0x13   :  { %s29_s23 = sshll.u32 %s2052_s22, 4  ;;  %s55_s0 = sshll.u32 %s2053_s24, 4  ;;  %s30_s23 = int_to_ptr.vmem [resolvable:$true] %s29_s23  ;;  %s56_s0 = int_to_ptr.vmem [resolvable:$true] %s55_s0 }
  0x14   :  { %35 = dma.hbm_to_vmem [thread:$0]  %s28_s19, 1024, %s30_s23, [#allocation3], %s2047_s25, %s2047_s25, %s2048_s26  }
  0x15   :  { %s2054_s27 = smov 128   ;;  %s2055_s28 = smov 8  }
  0x16   :  { %61 = dma.hbm_to_vmem [thread:$0]  %s54_s21, 2048, %s56_s0, [#allocation6], %s2054_s27, %s2054_s27, %s2055_s28  }
  0x17   :  { %s79_s2 = sshll.u32 %s2209_s4, 4  ;;  %s2056_s1 = smov [#allocation10]   ;;  %s80_s2 = int_to_ptr.hbm [resolvable:$true] %s79_s2 }
  0x18   :  { %s81_s3 = sshll.u32 %s2056_s1, 4  ;;  %s105_s14 = sshll.u32 %s2211_s6, 4  ;;  %s82_s3 = int_to_ptr.vmem [resolvable:$true] %s81_s3  ;;  %s106_s14 = int_to_ptr.hbm [resolvable:$true] %s105_s14 }
  0x19   :  { %87 = dma.hbm_to_vmem [thread:$0]  %s80_s2, 512, %s82_s3, [#allocation9], %s2047_s25, %s2047_s25, %s2048_s26  }
  0x1a   :  { %s2057_s15 = smov [#allocation13]   ;;  %s131_s18 = sshll.u32 %s2213_s8, 4  ;;  %s132_s18 = int_to_ptr.hbm [resolvable:$true] %s131_s18 }
  0x1b   :  { %s107_s16 = sshll.u32 %s2057_s15, 4  ;;  %s144_s6 = sshll.u32 %s2214_s9, 4  ;;  %s108_s16 = int_to_ptr.vmem [resolvable:$true] %s107_s16  ;;  %s145_s6 = int_to_ptr.hbm [resolvable:$true] %s144_s6 }
  0x1c   :  { %113 = dma.hbm_to_vmem [thread:$0]  %s106_s14, 1024, %s108_s16, [#allocation12], %s2047_s25, %s2047_s25, %s2048_s26  }
  0x1d   :  { %s2058_s7 = smov [#allocation16]   ;;  %s2059_s21 = smov [#allocation17]  }
  0x1e   :  { %s133_s20 = sshll.u32 %s2058_s7, 4  ;;  %s146_s8 = sshll.u32 %s2059_s21, 4  ;;  %s134_s20 = int_to_ptr.vmem [resolvable:$true] %s133_s20  ;;  %s147_s8 = int_to_ptr.vmem [resolvable:$true] %s146_s8 }
  0x1f   :  { %139 = dma.hbm_to_vmem [thread:$0]  %s132_s18, 1024, %s134_s20, [#allocation15], %s2047_s25, %s2047_s25, %s2048_s26  }
  0x20   :  { %152 = dma.hbm_to_vmem [thread:$0]  %s145_s6, 1024, %s147_s8, [#allocation18], %s2047_s25, %s2047_s25, %s2048_s26  }
  0x21   :  { %2032 = dma.done.wait [#allocation3], 1024  }
  0x22   :  { %2033 = vsyncadd [#allocation3], 4294966272 }
  0x23   :  { %2034 = dma.done.wait [#allocation6], 4096  }
  0x24   :  { %2035 = vsyncadd [#allocation6], 4294963200 }
  0x25   :  { %2036 = dma.done.wait [#allocation9], 1024  }
  0x26   :  { %2037 = vsyncadd [#allocation9], 4294966272 }
  0x27   :  { %2038 = dma.done.wait [#allocation12], 2048  }
  0x28   :  { %2039 = vsyncadd [#allocation12], 4294965248 }
  0x29   :  { %2040 = dma.done.wait [#allocation15], 2048  }
  0x2a   :  { %2041 = vsyncadd [#allocation15], 4294965248 }
  0x2b   :  { %2042 = dma.done.wait [#allocation18], 1024  }
  0x2c   :  { %2043 = vsyncadd [#allocation18], 4294966272  ;;  %v1671_v0 = vld [vmem:[#allocation5 + $0x38] sm:$0xff]  ;;  %v1670_v2 = vld [vmem:[#allocation5 + $0x30] sm:$0xff]  ;;  %s1278_s24 = sshll.u32 %s2216_s11, 4  ;;  %s1279_s24 = int_to_ptr.hbm [resolvable:$true] %s1278_s24 }
  0x2d   :  { %v1679_v1 = vld [vmem:[#allocation5 + $0x78] sm:$0xff]  ;;  %419 = vmatpush.bf16.msra.mxu0 %v1671_v0  ;;  %v1678_v3 = vld [vmem:[#allocation5 + $0x70] sm:$0xff]  ;;  %v1669_v4 = vld [vmem:[#allocation5 + $0x28] sm:$0xff] }
  0x2e   :  { %468 = vmatpush.bf16.msra.mxu1 %v1679_v1  ;;  %v1677_v5 = vld [vmem:[#allocation5 + $0x68] sm:$0xff]  ;;  %v1668_v6 = vld [vmem:[#allocation5 + $0x20] sm:$0xff]  ;;  %v1667_v8 = vld [vmem:[#allocation5 + $0x18] sm:$0xff] }
  0x2f   :  { %v1676_v7 = vld [vmem:[#allocation5 + $0x60] sm:$0xff]  ;;  %v1675_v9 = vld [vmem:[#allocation5 + $0x58] sm:$0xff]  ;;  %v1666_v10 = vld [vmem:[#allocation5 + $0x10] sm:$0xff] }
  0x30   :  { %v1674_v11 = vld [vmem:[#allocation5 + $0x50] sm:$0xff]  ;;  %v1665_v12 = vld [vmem:[#allocation5 + $0x8] sm:$0xff]  ;;  %v1664_v14 = vld [vmem:[#allocation5] sm:$0xff] }
  0x31   :  { %420 = vmatpush.bf16.msra.mxu0 %v1670_v2  ;;  %v1673_v13 = vld [vmem:[#allocation5 + $0x48] sm:$0xff]  ;;  %v1672_v15 = vld [vmem:[#allocation5 + $0x40] sm:$0xff]  ;;  %v1306_v22 = vld [vmem:[#allocation7 + $0x10] sm:$0xf] }
  0x32   :  { %469 = vmatpush.bf16.msra.mxu1 %v1678_v3  ;;  %v1298_v16 = vld [vmem:[#allocation7] sm:$0xf]  ;;  %v1649_v17 = vld [vmem:[#allocation7 + $0x4] sm:$0xf0]  ;;  %v1648_v18 = vld [vmem:[#allocation7 + $0x4] sm:$0xf] }
  0x33   :  { %v1300_v19 = vld [vmem:[#allocation7 + $0x8] sm:$0xf0]  ;;  %v1299_v20 = vor.u32 %v1649_v17, %v1298_v16  ;;  %v1651_v23 = vld [vmem:[#allocation7 + $0x14] sm:$0xf0]  ;;  %v1650_v24 = vld [vmem:[#allocation7 + $0x14] sm:$0xf] }
  0x34   :  { %v1303_v21 = vor.u32 %v1648_v18, %v1300_v19  ;;  %v1308_v25 = vld [vmem:[#allocation7 + $0x18] sm:$0xf0]  ;;  %v1307_v26 = vor.u32 %v1651_v23, %v1306_v22  ;;  %v1314_v28 = vld [vmem:[#allocation7 + $0x20] sm:$0xf]  ;;  %v1653_v29 = vld [vmem:[#allocation7 + $0x24] sm:$0xf0] }
  0x35   :  { %421 = vmatpush.bf16.msra.mxu0 %v1669_v4  ;;  %v1311_v27 = vor.u32 %v1650_v24, %v1308_v25  ;;  %v1652_v30 = vld [vmem:[#allocation7 + $0x24] sm:$0xf]  ;;  %v1316_v31 = vld [vmem:[#allocation7 + $0x28] sm:$0xf0]  ;;  %v1315_v32 = vor.u32 %v1653_v29, %v1314_v28  ;;  %v1322_v34 = vld [vmem:[#allocation7 + $0x30] sm:$0xf] }
  0x36   :  { %470 = vmatpush.bf16.msra.mxu1 %v1677_v5  ;;  %v1319_v33 = vor.u32 %v1652_v30, %v1316_v31  ;;  %v1655_v35 = vld [vmem:[#allocation7 + $0x34] sm:$0xf0]  ;;  %v1654_v36 = vld [vmem:[#allocation7 + $0x34] sm:$0xf]  ;;  %v1324_v37 = vld [vmem:[#allocation7 + $0x38] sm:$0xf0] }
  0x37   :  { %v1323_v38 = vor.u32 %v1655_v35, %v1322_v34  ;;  %v1327_v39 = vor.u32 %v1654_v36, %v1324_v37  ;;  %v1330_v40 = vld [vmem:[#allocation7 + $0x40] sm:$0xf]  ;;  %v1657_v41 = vld [vmem:[#allocation7 + $0x44] sm:$0xf0]  ;;  %v1656_v42 = vld [vmem:[#allocation7 + $0x44] sm:$0xf] }
  0x38   :  { %v1332_v43 = vld [vmem:[#allocation7 + $0x48] sm:$0xf0]  ;;  %v1331_v44 = vor.u32 %v1657_v41, %v1330_v40  ;;  %v1695_v46 = vld [vmem:[#allocation11 + $0x38] sm:$0xff]  ;;  %v1694_v48 = vld [vmem:[#allocation11 + $0x30] sm:$0xff] }
  0x39   :  { %422 = vmatpush.bf16.msra.mxu0 %v1668_v6  ;;  %v1335_v45 = vor.u32 %v1656_v42, %v1332_v43  ;;  %v1703_v47 = vld [vmem:[#allocation13 + $0x38] sm:$0xff]  ;;  %766 = vmatpush.bf16.msra.mxu3 %v1695_v46  ;;  %v1702_v49 = vld [vmem:[#allocation13 + $0x30] sm:$0xff]  ;;  %v1693_v50 = vld [vmem:[#allocation11 + $0x28] sm:$0xff] }
  0x3a   :  { %471 = vmatpush.bf16.msra.mxu1 %v1676_v7  ;;  %621 = vmatpush.bf16.msra.mxu2 %v1703_v47  ;;  %v1338_v51 = vld [vmem:[#allocation7 + $0x50] sm:$0xf]  ;;  %v1659_v52 = vld [vmem:[#allocation7 + $0x54] sm:$0xf0]  ;;  %v1658_v53 = vld [vmem:[#allocation7 + $0x54] sm:$0xf] }
  0x3b   :  { %v1340_v54 = vld [vmem:[#allocation7 + $0x58] sm:$0xf0]  ;;  %v1692_v55 = vld [vmem:[#allocation11 + $0x20] sm:$0xff]  ;;  %v1339_v56 = vor.u32 %v1659_v52, %v1338_v51  ;;  %v1701_v58 = vld [vmem:[#allocation13 + $0x28] sm:$0xff] }
  0x3c   :  { %v1343_v57 = vor.u32 %v1658_v53, %v1340_v54  ;;  %v1691_v59 = vld [vmem:[#allocation11 + $0x18] sm:$0xff]  ;;  %v1700_v60 = vld [vmem:[#allocation13 + $0x20] sm:$0xff]  ;;  %v1690_v61 = vld [vmem:[#allocation11 + $0x10] sm:$0xff] }
  0x3d   :  { %423 = vmatpush.bf16.msra.mxu0 %v1667_v8  ;;  %767 = vmatpush.bf16.msra.mxu3 %v1694_v48  ;;  %v1699_v62 = vld [vmem:[#allocation13 + $0x18] sm:$0xff]  ;;  %v1689_v63 = vld [vmem:[#allocation11 + $0x8] sm:$0xff]  ;;  %v1346_v0 = vld [vmem:[#allocation7 + $0x60] sm:$0xf] }
  0x3e   :  { %472 = vmatpush.bf16.msra.mxu1 %v1675_v9  ;;  %622 = vmatpush.bf16.msra.mxu2 %v1702_v49  ;;  %v1661_v1 = vld [vmem:[#allocation7 + $0x64] sm:$0xf0]  ;;  %v1660_v2 = vld [vmem:[#allocation7 + $0x64] sm:$0xf]  ;;  %v1348_v3 = vld [vmem:[#allocation7 + $0x68] sm:$0xf0] }
  0x3f   :  { %v1347_v4 = vor.u32 %v1661_v1, %v1346_v0  ;;  %v1351_v5 = vor.u32 %v1660_v2, %v1348_v3  ;;  %v1698_v6 = vld [vmem:[#allocation13 + $0x10] sm:$0xff]  ;;  %v1688_v7 = vld [vmem:[#allocation11] sm:$0xff]  ;;  %v1697_v9 = vld [vmem:[#allocation13 + $0x8] sm:$0xff] }
  0x40   :  { %v1680_v8 = vld [vmem:[#allocation2] sm:$0xff]  ;;  %v1681_v17 = vld [vmem:[#allocation2 + $0x8] sm:$0xff]  ;;  %v1683_v28 = vld [vmem:[#allocation2 + $0x18] sm:$0xff] }
  0x41   :  { %424 = vmatpush.bf16.msra.mxu0 %v1666_v10  ;;  %768 = vmatpush.bf16.msra.mxu3 %v1693_v50  ;;  %v1696_v10 = vld [vmem:[#allocation13] sm:$0xff]  ;;  %v1686_v52 = vld [vmem:[#allocation2 + $0x30] sm:$0xff] }
  0x42   :  { %473 = vmatpush.bf16.msra.mxu1 %v1674_v11  ;;  %623 = vmatpush.bf16.msra.mxu2 %v1701_v58  ;;  %v1354_v11 = vld [vmem:[#allocation7 + $0x70] sm:$0xf]  ;;  %v1684_v36 = vld [vmem:[#allocation2 + $0x20] sm:$0xff] }
  0x45   :  { %425 = vmatpush.bf16.msra.mxu0 %v1665_v12  ;;  %769 = vmatpush.bf16.msra.mxu3 %v1692_v55  ;;  %v1663_v12 = vld [vmem:[#allocation7 + $0x74] sm:$0xf0] }
  0x46   :  { %474 = vmatpush.bf16.msra.mxu1 %v1673_v13  ;;  %624 = vmatpush.bf16.msra.mxu2 %v1700_v60  ;;  %v1662_v13 = vld [vmem:[#allocation7 + $0x74] sm:$0xf]  ;;  %v1687_v60 = vld [vmem:[#allocation2 + $0x38] sm:$0xff] }
  0x49   :  { %426 = vmatpush.bf16.msra.mxu0 %v1664_v14  ;;  %770 = vmatpush.bf16.msra.mxu3 %v1691_v59  ;;  %v1356_v14 = vld [vmem:[#allocation7 + $0x78] sm:$0xf0] }
  0x4a   :  { %475 = vmatpush.bf16.msra.mxu1 %v1672_v15  ;;  %625 = vmatpush.bf16.msra.mxu2 %v1699_v62  ;;  %v1355_v15 = vor.u32 %v1663_v12, %v1354_v11  ;;  %v1359_v16 = vor.u32 %v1662_v13, %v1356_v14 }
  0x4c   :  { %427 = vmatmul.bf16.vlgmr.msra.gmra.mxu0 %v1299_v20  ;;  %v1682_v20 = vld [vmem:[#allocation2 + $0x10] sm:$0xff] }
  0x4d   :  { %476 = vmatmul.bf16.vlgmr.msra.gmra.mxu1 %v1303_v21  ;;  %771 = vmatpush.bf16.msra.mxu3 %v1690_v61 }
  0x4e   :  { %626 = vmatpush.bf16.msra.mxu2 %v1698_v6 }
  0x51   :  { %772 = vmatpush.bf16.msra.mxu3 %v1689_v63 }
  0x52   :  { %627 = vmatpush.bf16.msra.mxu2 %v1697_v9 }
  0x55   :  { %773 = vmatpush.bf16.msra.mxu3 %v1688_v7 }
  0x56   :  { %628 = vmatpush.bf16.msra.mxu2 %v1696_v10 }
  0x58   :  { %774 = vmatmul.bf16.vlgmr.msra.gmra.mxu3 %v1680_v8 }
  0x5c   :  { %432 = vmatmul.bf16.gmra.mxu0 %v1307_v26 }
  0x5d   :  { %481 = vmatmul.bf16.gmra.mxu1 %v1311_v27 }
  0x68   :  { %779 = vmatmul.bf16.gmra.mxu3 %v1681_v17 }
  0x6c   :  { %437 = vmatmul.bf16.gmra.mxu0 %v1315_v32 }
  0x6d   :  { %486 = vmatmul.bf16.gmra.mxu1 %v1319_v33 }
  0x78   :  { %784 = vmatmul.bf16.gmra.mxu3 %v1682_v20 }
  0x7c   :  { %442 = vmatmul.bf16.gmra.mxu0 %v1323_v38 }
  0x7d   :  { %491 = vmatmul.bf16.gmra.mxu1 %v1327_v39 }
  0x88   :  { %789 = vmatmul.bf16.gmra.mxu3 %v1683_v28 }
  0x8c   :  { %447 = vmatmul.bf16.gmra.mxu0 %v1331_v44  ;;  %v1685_v44 = vld [vmem:[#allocation2 + $0x28] sm:$0xff] }
  0x8d   :  { %496 = vmatmul.bf16.gmra.mxu1 %v1335_v45 }
  0x98   :  { %794 = vmatmul.bf16.gmra.mxu3 %v1684_v36 }
  0x9c   :  { %452 = vmatmul.bf16.gmra.mxu0 %v1339_v56 }
  0x9d   :  { %501 = vmatmul.bf16.gmra.mxu1 %v1343_v57 }
  0xa8   :  { %799 = vmatmul.bf16.gmra.mxu3 %v1685_v44 }
  0xac   :  { %457 = vmatmul.bf16.gmra.mxu0 %v1347_v4 }
  0xad   :  { %506 = vmatmul.bf16.gmra.mxu1 %v1351_v5 }
  0xb8   :  { %804 = vmatmul.bf16.gmra.mxu3 %v1686_v52 }
  0xbc   :  { %462 = vmatmul.bf16.gmra.mxu0 %v1355_v15 }
  0xbd   :  { %511 = vmatmul.bf16.gmra.mxu1 %v1359_v16 }
  0xc8   :  { %809 = vmatmul.bf16.gmra.mxu3 %v1687_v60 }
  0xc9   :  { %v428_v18 = vpop.f32.mrf.mxu0 }
  0xca   :  { %v477_v19 = vpop.f32.mrf.mxu1 }
  0xcb   :  { %v478_v23 = vadd.f32 %v477_v19, %v428_v18 }
  0xd1   :  { %v430_v21 = vpop.f32.mrf.mxu0 }
  0xd2   :  { %v479_v22 = vpop.f32.mrf.mxu1 }
  0xd3   :  { %v480_v24 = vadd.f32 %v479_v22, %v430_v21 }
  0xd5   :  { %v549_v25 = vpack.c.bf16 %v480_v24, %v478_v23 }
  0xd7   :  { %629 = vmatmul.bf16.vlgmr.msra.gmra.mxu2 %v549_v25 }
  0xd9   :  { %v433_v26 = vpop.f32.mrf.mxu0 }
  0xda   :  { %v482_v27 = vpop.f32.mrf.mxu1 }
  0xdb   :  { %v483_v31 = vadd.f32 %v482_v27, %v433_v26  ;;  %v775_v11 = vpop.f32.mrf.mxu3 }
  0xe1   :  { %v435_v29 = vpop.f32.mrf.mxu0 }
  0xe2   :  { %v484_v30 = vpop.f32.mrf.mxu1 }
  0xe3   :  { %v485_v32 = vadd.f32 %v484_v30, %v435_v29  ;;  %v777_v17 = vpop.f32.mrf.mxu3 }
  0xe5   :  { %v550_v33 = vpack.c.bf16 %v485_v32, %v483_v31 }
  0xe7   :  { %634 = vmatmul.bf16.gmra.mxu2 %v550_v33 }
  0xe9   :  { %v438_v34 = vpop.f32.mrf.mxu0 }
  0xea   :  { %v487_v35 = vpop.f32.mrf.mxu1 }
  0xeb   :  { %v488_v39 = vadd.f32 %v487_v35, %v438_v34  ;;  %v780_v18 = vpop.f32.mrf.mxu3 }
  0xf1   :  { %v440_v37 = vpop.f32.mrf.mxu0 }
  0xf2   :  { %v489_v38 = vpop.f32.mrf.mxu1 }
  0xf3   :  { %v490_v40 = vadd.f32 %v489_v38, %v440_v37  ;;  %v782_v20 = vpop.f32.mrf.mxu3 }
  0xf5   :  { %v551_v41 = vpack.c.bf16 %v490_v40, %v488_v39 }
  0xf7   :  { %639 = vmatmul.bf16.gmra.mxu2 %v551_v41 }
  0xf9   :  { %v443_v42 = vpop.f32.mrf.mxu0 }
  0xfa   :  { %v492_v43 = vpop.f32.mrf.mxu1 }
  0xfb   :  { %v493_v47 = vadd.f32 %v492_v43, %v443_v42  ;;  %v785_v24 = vpop.f32.mrf.mxu3 }
 0x101   :  { %v445_v45 = vpop.f32.mrf.mxu0 }
 0x102   :  { %v494_v46 = vpop.f32.mrf.mxu1 }
 0x103   :  { %v495_v48 = vadd.f32 %v494_v46, %v445_v45  ;;  %v787_v30 = vpop.f32.mrf.mxu3 }
 0x105   :  { %v552_v49 = vpack.c.bf16 %v495_v48, %v493_v47 }
 0x107   :  { %644 = vmatmul.bf16.gmra.mxu2 %v552_v49 }
 0x109   :  { %v448_v50 = vpop.f32.mrf.mxu0 }
 0x10a   :  { %v497_v51 = vpop.f32.mrf.mxu1 }
 0x10b   :  { %v498_v55 = vadd.f32 %v497_v51, %v448_v50  ;;  %v790_v36 = vpop.f32.mrf.mxu3 }
 0x111   :  { %v450_v53 = vpop.f32.mrf.mxu0 }
 0x112   :  { %v499_v54 = vpop.f32.mrf.mxu1 }
 0x113   :  { %v500_v56 = vadd.f32 %v499_v54, %v450_v53  ;;  %v792_v40 = vpop.f32.mrf.mxu3 }
 0x115   :  { %v553_v57 = vpack.c.bf16 %v500_v56, %v498_v55 }
 0x117   :  { %649 = vmatmul.bf16.gmra.mxu2 %v553_v57 }
 0x119   :  { %v453_v58 = vpop.f32.mrf.mxu0 }
 0x11a   :  { %v502_v59 = vpop.f32.mrf.mxu1 }
 0x11b   :  { %v503_v63 = vadd.f32 %v502_v59, %v453_v58  ;;  %v795_v47 = vpop.f32.mrf.mxu3 }
 0x121   :  { %v455_v61 = vpop.f32.mrf.mxu0 }
 0x122   :  { %v504_v62 = vpop.f32.mrf.mxu1 }
 0x123   :  { %v505_v0 = vadd.f32 %v504_v62, %v455_v61  ;;  %v797_v52 = vpop.f32.mrf.mxu3 }
 0x125   :  { %v554_v1 = vpack.c.bf16 %v505_v0, %v503_v63 }
 0x127   :  { %654 = vmatmul.bf16.gmra.mxu2 %v554_v1 }
 0x129   :  { %v458_v2 = vpop.f32.mrf.mxu0 }
 0x12a   :  { %v507_v3 = vpop.f32.mrf.mxu1 }
 0x12b   :  { %v508_v6 = vadd.f32 %v507_v3, %v458_v2  ;;  %v800_v56 = vpop.f32.mrf.mxu3 }
 0x131   :  { %v460_v4 = vpop.f32.mrf.mxu0 }
 0x132   :  { %v509_v5 = vpop.f32.mrf.mxu1 }
 0x133   :  { %v510_v7 = vadd.f32 %v509_v5, %v460_v4  ;;  %v802_v59 = vpop.f32.mrf.mxu3 }
 0x135   :  { %v555_v8 = vpack.c.bf16 %v510_v7, %v508_v6 }
 0x137   :  { %659 = vmatmul.bf16.gmra.mxu2 %v555_v8 }
 0x139   :  { %v463_v9 = vpop.f32.mrf.mxu0 }
 0x13a   :  { %v512_v10 = vpop.f32.mrf.mxu1 }
 0x13b   :  { %v513_v14 = vadd.f32 %v512_v10, %v463_v9  ;;  %v805_v61 = vpop.f32.mrf.mxu3 }
 0x141   :  { %v465_v12 = vpop.f32.mrf.mxu0 }
 0x142   :  { %v514_v13 = vpop.f32.mrf.mxu1 }
 0x143   :  { %v515_v15 = vadd.f32 %v514_v13, %v465_v12  ;;  %v807_v63 = vpop.f32.mrf.mxu3 }
 0x145   :  { %v556_v16 = vpack.c.bf16 %v515_v15, %v513_v14 }
 0x147   :  { %664 = vmatmul.bf16.gmra.mxu2 %v556_v16 }
 0x14b   :  { %v810_v1 = vpop.f32.mrf.mxu3 }
 0x153   :  { %v812_v4 = vpop.f32.mrf.mxu3 }
 0x15a   :  { %v630_v19 = vpop.f32.mrf.mxu2 }
 0x15b   :  { %v776_v21 = vadd.f32 %v775_v11, %v630_v19 }
 0x15d   :  { %v815_v25 = vmax.f32 %v776_v21, 0.0 }
 0x162   :  { %v632_v22 = vpop.f32.mrf.mxu2 }
 0x163   :  { %v778_v23 = vadd.f32 %v777_v17, %v632_v22 }
 0x165   :  { %v816_v26 = vmax.f32 %v778_v23, 0.0 }
 0x167   :  { %v2181_v27 = vpack.c.bf16 %v816_v26, %v815_v25  ;;  %v1704_v25 = vld [vmem:[#allocation8] sm:$0xff]  ;;  %v1707_v26 = vld [vmem:[#allocation8 + $0x18] sm:$0xff] }
 0x16a   :  { %v635_v28 = vpop.f32.mrf.mxu2 }
 0x16b   :  { %v781_v29 = vadd.f32 %v780_v18, %v635_v28  ;;  %v1705_v28 = vld [vmem:[#allocation8 + $0x8] sm:$0xff] }
 0x16d   :  { %v817_v33 = vmax.f32 %v781_v29, 0.0  ;;  %v1708_v29 = vld [vmem:[#allocation10] sm:$0xff] }
 0x172   :  { %v637_v31 = vpop.f32.mrf.mxu2 }
 0x173   :  { %v783_v32 = vadd.f32 %v782_v20, %v637_v31  ;;  %v1710_v31 = vld [vmem:[#allocation10 + $0x10] sm:$0xff] }
 0x175   :  { %v818_v34 = vmax.f32 %v783_v32, 0.0  ;;  %v1719_v32 = vld [vmem:[#allocation14 + $0x38] sm:$0xff] }
 0x176   :  { %1126 = vmatpush.bf16.msrb.mxu3 %v1719_v32 }
 0x177   :  { %v2183_v35 = vpack.c.bf16 %v818_v34, %v817_v33  ;;  %v1718_v33 = vld [vmem:[#allocation14 + $0x30] sm:$0xff]  ;;  %v1711_v34 = vld [vmem:[#allocation10 + $0x18] sm:$0xff] }
 0x17a   :  { %v640_v37 = vpop.f32.mrf.mxu2  ;;  %1127 = vmatpush.bf16.msrb.mxu3 %v1718_v33 }
 0x17b   :  { %v786_v38 = vadd.f32 %v785_v24, %v640_v37  ;;  %v1706_v24 = vld [vmem:[#allocation8 + $0x10] sm:$0xff]  ;;  %v1716_v37 = vld [vmem:[#allocation14 + $0x20] sm:$0xff] }
 0x17d   :  { %v819_v42 = vmax.f32 %v786_v38, 0.0  ;;  %v1715_v38 = vld [vmem:[#allocation14 + $0x18] sm:$0xff] }
 0x182   :  { %v642_v39 = vpop.f32.mrf.mxu2 }
 0x183   :  { %v788_v41 = vadd.f32 %v787_v30, %v642_v39  ;;  %v1709_v30 = vld [vmem:[#allocation10 + $0x8] sm:$0xff] }
 0x184   :  { %v1713_v39 = vld [vmem:[#allocation14 + $0x8] sm:$0xff] }
 0x185   :  { %v820_v43 = vmax.f32 %v788_v41, 0.0  ;;  %v1726_v41 = vld [vmem:[#allocation16 + $0x30] sm:$0xff] }
 0x187   :  { %v2185_v44 = vpack.c.bf16 %v820_v43, %v819_v42  ;;  %v1725_v42 = vld [vmem:[#allocation16 + $0x28] sm:$0xff]  ;;  %v1724_v43 = vld [vmem:[#allocation16 + $0x20] sm:$0xff] }
 0x18a   :  { %v645_v45 = vpop.f32.mrf.mxu2 }
 0x18b   :  { %v791_v46 = vadd.f32 %v790_v36, %v645_v45  ;;  %v1717_v36 = vld [vmem:[#allocation14 + $0x28] sm:$0xff]  ;;  %v1722_v45 = vld [vmem:[#allocation16 + $0x10] sm:$0xff] }
 0x18c   :  { %1128 = vmatpush.bf16.msrb.mxu3 %v1717_v36 }
 0x18d   :  { %v821_v50 = vmax.f32 %v791_v46, 0.0 }
 0x190   :  { %1129 = vmatpush.bf16.msrb.mxu3 %v1716_v37 }
 0x192   :  { %v647_v48 = vpop.f32.mrf.mxu2 }
 0x193   :  { %v793_v49 = vadd.f32 %v792_v40, %v647_v48  ;;  %v1712_v40 = vld [vmem:[#allocation14] sm:$0xff]  ;;  %v1721_v48 = vld [vmem:[#allocation16 + $0x8] sm:$0xff] }
 0x194   :  { %1130 = vmatpush.bf16.msrb.mxu3 %v1715_v38 }
 0x195   :  { %v822_v51 = vmax.f32 %v793_v49, 0.0  ;;  %v1720_v49 = vld [vmem:[#allocation16] sm:$0xff] }
 0x197   :  { %v834_v53 = vpack.c.bf16 %v822_v51, %v821_v50 }
 0x19a   :  { %v650_v54 = vpop.f32.mrf.mxu2 }
 0x19b   :  { %v796_v55 = vadd.f32 %v795_v47, %v650_v54 }
 0x19d   :  { %v823_v22 = vmax.f32 %v796_v55, 0.0 }
 0x1a2   :  { %v652_v57 = vpop.f32.mrf.mxu2 }
 0x1a3   :  { %v798_v16 = vadd.f32 %v797_v52, %v652_v57 }
 0x1a5   :  { %v824_v20 = vmax.f32 %v798_v16, 0.0 }
 0x1a7   :  { %v835_v23 = vpack.c.bf16 %v824_v20, %v823_v22 }
 0x1aa   :  { %v655_v58 = vpop.f32.mrf.mxu2 }
 0x1ab   :  { %v801_v14 = vadd.f32 %v800_v56, %v655_v58 }
 0x1ad   :  { %v825_v19 = vmax.f32 %v801_v14, 0.0  ;;  %v1729_v14 = vld [vmem:[#allocation17 + $0x8] sm:$0xff] }
 0x1b2   :  { %v657_v60 = vpop.f32.mrf.mxu2 }
 0x1b3   :  { %v803_v11 = vadd.f32 %v802_v59, %v657_v60 }
 0x1b5   :  { %v826_v17 = vmax.f32 %v803_v11, 0.0 }
 0x1b7   :  { %v836_v21 = vpack.c.bf16 %v826_v17, %v825_v19 }
 0x1ba   :  { %v660_v62 = vpop.f32.mrf.mxu2 }
 0x1bb   :  { %v806_v8 = vadd.f32 %v805_v61, %v660_v62 }
 0x1bd   :  { %v827_v15 = vmax.f32 %v806_v8, 0.0 }
 0x1c2   :  { %v662_v0 = vpop.f32.mrf.mxu2 }
 0x1c3   :  { %v808_v6 = vadd.f32 %v807_v63, %v662_v0 }
 0x1c5   :  { %v828_v12 = vmax.f32 %v808_v6, 0.0  ;;  %v1732_v6 = vld [vmem:[#allocation17 + $0x20] sm:$0xff] }
 0x1c7   :  { %v837_v18 = vpack.c.bf16 %v828_v12, %v827_v15  ;;  %v1731_v12 = vld [vmem:[#allocation17 + $0x18] sm:$0xff]  ;;  %v1728_v15 = vld [vmem:[#allocation17] sm:$0xff] }
 0x1ca   :  { %v665_v2 = vpop.f32.mrf.mxu2 }
 0x1cb   :  { %v811_v3 = vadd.f32 %v810_v1, %v665_v2  ;;  %v1735_v2 = vld [vmem:[#allocation17 + $0x38] sm:$0xff] }
 0x1cd   :  { %v829_v9 = vmax.f32 %v811_v3, 0.0  ;;  %v1734_v3 = vld [vmem:[#allocation17 + $0x30] sm:$0xff] }
 0x1d2   :  { %v667_v5 = vpop.f32.mrf.mxu2 }
 0x1d3   :  { %v813_v7 = vadd.f32 %v812_v4, %v667_v5  ;;  %v1733_v5 = vld [vmem:[#allocation17 + $0x28] sm:$0xff] }
 0x1d5   :  { %v830_v10 = vmax.f32 %v813_v7, 0.0 }
 0x1d7   :  { %v838_v13 = vpack.c.bf16 %v830_v10, %v829_v9 }
 0x1d9   :  { %871 = vmatpush.bf16.msrb.mxu0 %v838_v13  ;;  %1736 = vmatpush.bf16.msrb.mxu1 %v838_v13 }
 0x1dd   :  { %872 = vmatpush.bf16.msrb.mxu0 %v837_v18  ;;  %1737 = vmatpush.bf16.msrb.mxu1 %v837_v18 }
 0x1e1   :  { %873 = vmatpush.bf16.msrb.mxu0 %v836_v21  ;;  %1738 = vmatpush.bf16.msrb.mxu1 %v836_v21 }
 0x1e5   :  { %874 = vmatpush.bf16.msrb.mxu0 %v835_v23  ;;  %1739 = vmatpush.bf16.msrb.mxu1 %v835_v23 }
 0x1e9   :  { %875 = vmatpush.bf16.msrb.mxu0 %v834_v53  ;;  %1740 = vmatpush.bf16.msrb.mxu1 %v834_v53 }
 0x1ed   :  { %876 = vmatpush.bf16.msrb.mxu0 %v2185_v44  ;;  %1741 = vmatpush.bf16.msrb.mxu1 %v2185_v44 }
 0x1f1   :  { %877 = vmatpush.bf16.msrb.mxu0 %v2183_v35  ;;  %1742 = vmatpush.bf16.msrb.mxu1 %v2183_v35 }
 0x1f5   :  { %878 = vmatpush.bf16.msrb.mxu0 %v2181_v27  ;;  %1743 = vmatpush.bf16.msrb.mxu1 %v2181_v27 }
 0x1f8   :  { %889 = vmatmul.bf16.vlgmr.msrb.gmra.mxu1 %v1706_v24  ;;  %879 = vmatmul.bf16.vlgmr.msrb.gmra.mxu0 %v1704_v25 }
 0x1f9   :  { %936 = vmatpush.bf16.msra.mxu1 %v838_v13  ;;  %1235 = vmatpush.bf16.msra.mxu0 %v1735_v2  ;;  %v1730_v13 = vld [vmem:[#allocation17 + $0x10] sm:$0xff] }
 0x1fd   :  { %937 = vmatpush.bf16.msra.mxu1 %v837_v18  ;;  %1236 = vmatpush.bf16.msra.mxu0 %v1734_v3 }
 0x201   :  { %938 = vmatpush.bf16.msra.mxu1 %v836_v21  ;;  %1237 = vmatpush.bf16.msra.mxu0 %v1733_v5 }
 0x205   :  { %939 = vmatpush.bf16.msra.mxu1 %v835_v23  ;;  %1238 = vmatpush.bf16.msra.mxu0 %v1732_v6 }
 0x208   :  { %894 = vmatmul.bf16.gmra.mxu1 %v1707_v26  ;;  %884 = vmatmul.bf16.gmra.mxu0 %v1705_v28 }
 0x209   :  { %940 = vmatpush.bf16.msra.mxu1 %v834_v53  ;;  %1239 = vmatpush.bf16.msra.mxu0 %v1731_v12 }
 0x20d   :  { %941 = vmatpush.bf16.msra.mxu1 %v2185_v44  ;;  %v1723_v44 = vld [vmem:[#allocation16 + $0x18] sm:$0xff]  ;;  %1240 = vmatpush.bf16.msra.mxu0 %v1730_v13 }
 0x211   :  { %942 = vmatpush.bf16.msra.mxu1 %v2183_v35  ;;  %v1714_v35 = vld [vmem:[#allocation14 + $0x10] sm:$0xff]  ;;  %1241 = vmatpush.bf16.msra.mxu0 %v1729_v14 }
 0x212   :  { %1131 = vmatpush.bf16.msrb.mxu3 %v1714_v35 }
 0x215   :  { %943 = vmatpush.bf16.msra.mxu1 %v2181_v27  ;;  %v1727_v27 = vld [vmem:[#allocation16 + $0x38] sm:$0xff]  ;;  %1242 = vmatpush.bf16.msra.mxu0 %v1728_v15 }
 0x216   :  { %1049 = vmatpush.bf16.msrb.mxu2 %v1727_v27  ;;  %1132 = vmatpush.bf16.msrb.mxu3 %v1713_v39 }
 0x218   :  { %944 = vmatmul.bf16.vlgmr.msra.gmra.mxu1 %v1708_v29 }
 0x21a   :  { %1133 = vmatpush.bf16.msrb.mxu3 %v1712_v40  ;;  %1050 = vmatpush.bf16.msrb.mxu2 %v1726_v41 }
 0x21e   :  { %1051 = vmatpush.bf16.msrb.mxu2 %v1725_v42 }
 0x222   :  { %1052 = vmatpush.bf16.msrb.mxu2 %v1724_v43 }
 0x226   :  { %1053 = vmatpush.bf16.msrb.mxu2 %v1723_v44 }
 0x228   :  { %949 = vmatmul.bf16.gmra.mxu1 %v1709_v30 }
 0x22a   :  { %1054 = vmatpush.bf16.msrb.mxu2 %v1722_v45 }
 0x22e   :  { %1055 = vmatpush.bf16.msrb.mxu2 %v1721_v48 }
 0x232   :  { %1056 = vmatpush.bf16.msrb.mxu2 %v1720_v49 }
 0x236   :  { %1744 = vmatpush.bf16.msra.mxu2 %v1735_v2 }
 0x238   :  { %954 = vmatmul.bf16.gmra.mxu1 %v1710_v31 }
 0x23a   :  { %1745 = vmatpush.bf16.msra.mxu2 %v1734_v3 }
 0x23e   :  { %1746 = vmatpush.bf16.msra.mxu2 %v1733_v5 }
 0x242   :  { %1747 = vmatpush.bf16.msra.mxu2 %v1732_v6 }
 0x246   :  { %1748 = vmatpush.bf16.msra.mxu2 %v1731_v12 }
 0x248   :  { %959 = vmatmul.bf16.gmra.mxu1 %v1711_v34 }
 0x24a   :  { %1749 = vmatpush.bf16.msra.mxu2 %v1730_v13 }
 0x24e   :  { %1750 = vmatpush.bf16.msra.mxu2 %v1729_v14 }
 0x252   :  { %1751 = vmatpush.bf16.msra.mxu2 %v1728_v15 }
 0x275   :  { %v890_v46 = vpop.f32.mrf.mxu1  ;;  %v880_v47 = vpop.f32.mrf.mxu0 }
 0x27d   :  { %v892_v50 = vpop.f32.mrf.mxu1  ;;  %v882_v51 = vpop.f32.mrf.mxu0 }
 0x27e   :  { %v900_v52 = vpack.c.bf16 %v882_v51, %v880_v47  ;;  %v902_v60 = vpack.c.bf16 %v892_v50, %v890_v46 }
 0x280   :  { %1134 = vmatmul.bf16.vlgmr.msrb.gmra.mxu3 %v900_v52  ;;  %v1767_v52 = vld [vmem:[%s2215_s10] ss:$0 sm:$0xff]  ;;  %s2060_s10 = smov [#allocation19]  }
 0x281   :  { %s1276_s26 = sshll.u32 %s2060_s10, 4  ;;  %s1277_s26 = int_to_ptr.vmem [resolvable:$true] %s1276_s26 }
 0x285   :  { %v895_v53 = vpop.f32.mrf.mxu1  ;;  %v885_v54 = vpop.f32.mrf.mxu0 }
 0x28d   :  { %v897_v55 = vpop.f32.mrf.mxu1  ;;  %v887_v56 = vpop.f32.mrf.mxu0 }
 0x28e   :  { %v901_v57 = vpack.c.bf16 %v887_v56, %v885_v54  ;;  %v903_v0 = vpack.c.bf16 %v897_v55, %v895_v53 }
 0x290   :  { %1139 = vmatmul.bf16.gmra.mxu3 %v901_v57 }
 0x295   :  { %v945_v58 = vpop.f32.mrf.mxu1 }
 0x29d   :  { %v947_v59 = vpop.f32.mrf.mxu1 }
 0x29e   :  { %v965_v61 = vpack.c.bf16 %v947_v59, %v945_v58 }
 0x2a0   :  { %1057 = vmatmul.bf16.vlgmr.msrb.gmra.mxu2 %v965_v61  ;;  %1144 = vmatmul.bf16.gmra.mxu3 %v902_v60 }
 0x2a5   :  { %v950_v62 = vpop.f32.mrf.mxu1 }
 0x2ad   :  { %v952_v63 = vpop.f32.mrf.mxu1 }
 0x2ae   :  { %v966_v1 = vpack.c.bf16 %v952_v63, %v950_v62 }
 0x2b0   :  { %1062 = vmatmul.bf16.gmra.mxu2 %v966_v1  ;;  %1149 = vmatmul.bf16.gmra.mxu3 %v903_v0 }
 0x2b5   :  { %v955_v4 = vpop.f32.mrf.mxu1 }
 0x2bd   :  { %v957_v7 = vpop.f32.mrf.mxu1 }
 0x2be   :  { %v967_v8 = vpack.c.bf16 %v957_v7, %v955_v4 }
 0x2c0   :  { %1067 = vmatmul.bf16.gmra.mxu2 %v967_v8 }
 0x2c5   :  { %v960_v9 = vpop.f32.mrf.mxu1 }
 0x2cd   :  { %v962_v10 = vpop.f32.mrf.mxu1 }
 0x2ce   :  { %v968_v11 = vpack.c.bf16 %v962_v10, %v960_v9 }
 0x2d0   :  { %1072 = vmatmul.bf16.gmra.mxu2 %v968_v11 }
 0x303   :  { %v1135_v16 = vpop.f32.mrf.mxu3 }
 0x30b   :  { %v1137_v17 = vpop.f32.mrf.mxu3 }
 0x313   :  { %v1140_v19 = vpop.f32.mrf.mxu3 }
 0x31b   :  { %v1142_v28 = vpop.f32.mrf.mxu3 }
 0x323   :  { %v1058_v18 = vpop.f32.mrf.mxu2  ;;  %v1145_v32 = vpop.f32.mrf.mxu3 }
 0x324   :  { %v1136_v20 = vadd.f32 %v1135_v16, %v1058_v18 }
 0x326   :  { %v1155_v23 = vmax.f32 %v1136_v20, 0.0 }
 0x32b   :  { %v1060_v21 = vpop.f32.mrf.mxu2  ;;  %v1147_v38 = vpop.f32.mrf.mxu3 }
 0x32c   :  { %v1138_v22 = vadd.f32 %v1137_v17, %v1060_v21 }
 0x32e   :  { %v1156_v24 = vmax.f32 %v1138_v22, 0.0 }
 0x330   :  { %v1163_v25 = vpack.c.bf16 %v1156_v24, %v1155_v23 }
 0x332   :  { %1243 = vmatmul.bf16.vlgmr.msra.gmra.mxu0 %v1163_v25 }
 0x333   :  { %v1063_v26 = vpop.f32.mrf.mxu2  ;;  %v1150_v43 = vpop.f32.mrf.mxu3 }
 0x334   :  { %v1141_v29 = vadd.f32 %v1140_v19, %v1063_v26 }
 0x336   :  { %v1157_v33 = vmax.f32 %v1141_v29, 0.0 }
 0x33b   :  { %v1065_v30 = vpop.f32.mrf.mxu2  ;;  %v1152_v47 = vpop.f32.mrf.mxu3 }
 0x33c   :  { %v1143_v31 = vadd.f32 %v1142_v28, %v1065_v30 }
 0x33e   :  { %v1158_v34 = vmax.f32 %v1143_v31, 0.0 }
 0x340   :  { %v1164_v36 = vpack.c.bf16 %v1158_v34, %v1157_v33 }
 0x342   :  { %1248 = vmatmul.bf16.gmra.mxu0 %v1164_v36 }
 0x343   :  { %v1068_v37 = vpop.f32.mrf.mxu2 }
 0x344   :  { %v1146_v35 = vadd.f32 %v1145_v32, %v1068_v37 }
 0x346   :  { %v1159_v40 = vmax.f32 %v1146_v35, 0.0 }
 0x34b   :  { %v1070_v27 = vpop.f32.mrf.mxu2 }
 0x34c   :  { %v1148_v39 = vadd.f32 %v1147_v38, %v1070_v27 }
 0x34e   :  { %v1160_v41 = vmax.f32 %v1148_v39, 0.0 }
 0x350   :  { %v1165_v42 = vpack.c.bf16 %v1160_v41, %v1159_v40 }
 0x352   :  { %1253 = vmatmul.bf16.gmra.mxu0 %v1165_v42 }
 0x353   :  { %v1073_v44 = vpop.f32.mrf.mxu2 }
 0x354   :  { %v1151_v45 = vadd.f32 %v1150_v43, %v1073_v44 }
 0x356   :  { %v1161_v49 = vmax.f32 %v1151_v45, 0.0 }
 0x35b   :  { %v1075_v46 = vpop.f32.mrf.mxu2 }
 0x35c   :  { %v1153_v48 = vadd.f32 %v1152_v47, %v1075_v46 }
 0x35e   :  { %v1162_v50 = vmax.f32 %v1153_v48, 0.0 }
 0x360   :  { %v1166_v51 = vpack.c.bf16 %v1162_v50, %v1161_v49 }
 0x362   :  { %1258 = vmatmul.bf16.vlgmr.msra.gmra.mxu2 %v1166_v51 }
 0x3af   :  { %v1244_v53 = vpop.f32.mrf.mxu0 }
 0x3b0   :  { %v1245_v54 = vadd.f32 %v1767_v52, %v1244_v53 }
 0x3b2   :  { %1264 = vst [vmem:[#allocation19] sm:$0xff] %v1245_v54 }
 0x3b7   :  { %v1246_v55 = vpop.f32.mrf.mxu0 }
 0x3b8   :  { %v1247_v56 = vadd.f32 %v1767_v52, %v1246_v55 }
 0x3ba   :  { %1265 = vst [vmem:[#allocation19 + $0x8] sm:$0xff] %v1247_v56 }
 0x3bf   :  { %v1249_v57 = vpop.f32.mrf.mxu0 }
 0x3c0   :  { %v1250_v58 = vadd.f32 %v1767_v52, %v1249_v57 }
 0x3c2   :  { %1266 = vst [vmem:[#allocation19 + $0x10] sm:$0xff] %v1250_v58 }
 0x3c7   :  { %v1251_v59 = vpop.f32.mrf.mxu0 }
 0x3c8   :  { %v1252_v60 = vadd.f32 %v1767_v52, %v1251_v59 }
 0x3ca   :  { %1267 = vst [vmem:[#allocation19 + $0x18] sm:$0xff] %v1252_v60 }
 0x3cf   :  { %v1254_v61 = vpop.f32.mrf.mxu0 }
 0x3d0   :  { %v1255_v62 = vadd.f32 %v1767_v52, %v1254_v61 }
 0x3d2   :  { %1268 = vst [vmem:[#allocation19 + $0x20] sm:$0xff] %v1255_v62 }
 0x3d7   :  { %v1256_v63 = vpop.f32.mrf.mxu0 }
 0x3d8   :  { %v1257_v0 = vadd.f32 %v1767_v52, %v1256_v63 }
 0x3da   :  { %1269 = vst [vmem:[#allocation19 + $0x28] sm:$0xff] %v1257_v0 }
 0x3e5   :  { %v1259_v1 = vpop.f32.mrf.mxu2 }
 0x3e6   :  { %v1260_v2 = vadd.f32 %v1767_v52, %v1259_v1 }
 0x3e8   :  { %1270 = vst [vmem:[#allocation19 + $0x30] sm:$0xff] %v1260_v2 }
 0x3ed   :  { %v1261_v3 = vpop.f32.mrf.mxu2 }
 0x3ee   :  { %v1262_v4 = vadd.f32 %v1767_v52, %v1261_v3 }
 0x3f0   :  { %1271 = vst [vmem:[#allocation19 + $0x38] sm:$0xff] %v1262_v4 }
 0x3f1   :  { %1284 = dma.vmem_to_hbm [thread:$0]  %s1277_s26, 1024, %s1279_s24, [#allocation4], %s2054_s27, %s2054_s27, %s2055_s28  }
 0x3f2   :  { %2044 = dma.done.wait [#allocation4], 1024  }
 0x3f3   :  { %2045 = vsyncadd [#allocation4], 4294966272 }
 0x3f4   :  { %1289 = vsyncpa [#allocation3], 1 }
 0x3f5   :  { %1290 = vsyncpa [#allocation6], 1 }
 0x3f6   :  { %1291 = vsyncpa [#allocation9], 1 }
 0x3f7   :  { %1292 = vsyncpa [#allocation12], 1 }
 0x3f8   :  { %1293 = vsyncpa [#allocation15], 1 }
 0x3f9   :  { %1294 = vsyncpa [#allocation18], 1 }
 0x3fa   :  { %1295 = vsyncpa [#allocation4], 1 }

</bundles_post_ra>
